<compile_context>
chip_gen: v7x
topology: tpu7x:2x2x1
jax: 0.10.0
libtpu: 0.0.40
codegen_flags: <defaults>
</compile_context>

<pallas_src>
import numpy as np
import jax
import jax.numpy as jnp
from jax.experimental import pallas as pl
from jax.experimental.pallas import tpu as pltpu


def _conv1d_out_kernel(x_ref, w_ref, m_ref, b_ref, o_ref):
    # x_ref : (C, Lt)  VMEM input tile; Lt = h_tile * W (whole H-rows, fused on lanes)
    # w_ref : (C, 3)   VMEM conv weights (kw-minor)
    # m_ref : (2, Lt)  VMEM {0,1} masks: row 0 kills the left tap at w==0,
    #                  row 1 kills the right tap at w==W-1 ('same' zero pad)
    # b_ref : (1,)     SMEM bias
    # o_ref : (1, Lt)  VMEM output tile
    x = x_ref[...].astype(jnp.float32)                    # (C, Lt)
    w = w_ref[...].astype(jnp.float32)                    # (C, 3)
    Lt = x.shape[1]

    # Shifted taps via XLU rolls along the fused (H*W) lane axis; the
    # wrap-around / cross-row terms are zeroed by the masks.
    left = pltpu.roll(x, shift=1, axis=1) * m_ref[0:1, :]          # x[.., l-1]
    right = pltpu.roll(x, shift=Lt - 1, axis=1) * m_ref[1:2, :]    # x[.., l+1]

    acc = left * w[:, 0:1] + x * w[:, 1:2] + right * w[:, 2:3]     # (C, Lt)
    y = jnp.sum(acc, axis=0, keepdims=True) + b_ref[0]             # (1, Lt)
    o_ref[...] = y.astype(o_ref.dtype)                             # one dense store


def _pick_h_tile(N, C, H, W, tile_bytes):
    """Rows of the fused (H, W) axis per grid step (always a divisor of H)."""
    divisors = [d for d in range(1, H + 1) if H % d == 0]
    cands = [d for d in divisors if C * d * W * 4 <= tile_bytes] or [1]
    # Prefer lane-dense tiles (last block dim a multiple of 128) or the full axis.
    dense = [d for d in cands if (d * W) % 128 == 0 or d == H]
    if dense:
        cands = dense
    # Prefer >=4 total grid steps so the pipeline double-buffers and both v7x
    # TensorCores get >=2 steps each (harmless on single-core v5e/v6e).
    stepy = [d for d in cands if N * (H // d) >= 4]
    if stepy:
        cands = stepy
    return max(cands)


def conv1d_out(x, weight, bias, *, tile_bytes=2 << 20):
    """x: (N, C, H, W); weight: (1, C, 1, 3); bias: (1,) -> (N, 1, H, W)."""
    N, C, H, W = x.shape
    L = H * W
    h_tile = _pick_h_tile(N, C, H, W, tile_bytes)
    Lt = h_tile * W
    T = H // h_tile

    # Free views (contiguous trailing dims) -- no HBM transpose, no pad.
    x_fused = x.reshape(N, C, L)
    w2 = weight.astype(jnp.float32).reshape(C, 3)   # (1,C,1,3) -> c-major, kw-minor
    b1 = bias.astype(jnp.float32).reshape(1)

    # {0,1} boundary masks for the fused-axis rolls.  Tiles always start at a
    # multiple of W, so one (2, Lt) pattern serves every tile; its block index
    # is constant so it is copied to VMEM only once.
    col = np.arange(Lt) % W
    masks = jnp.asarray(np.stack([(col != 0), (col != W - 1)]).astype(np.float32))

    out = pl.pallas_call(
        _conv1d_out_kernel,
        out_shape=jax.ShapeDtypeStruct((N, 1, L), x.dtype),
        grid_spec=pltpu.PrefetchScalarGridSpec(
            num_scalar_prefetch=0,
            grid=(N, T),
            in_specs=[
                pl.BlockSpec((None, C, Lt), lambda n, t: (n, 0, t)),
                pl.BlockSpec((C, 3), lambda n, t: (0, 0)),
                pl.BlockSpec((2, Lt), lambda n, t: (0, 0)),
                pl.BlockSpec(memory_space=pltpu.MemorySpace.SMEM),
            ],
            out_specs=pl.BlockSpec((None, 1, Lt), lambda n, t: (n, 0, t)),
        ),
        compiler_params=pltpu.CompilerParams(
            dimension_semantics=("parallel", "parallel"),
            vmem_limit_bytes=32 * 1024 * 1024,
        ),
        cost_estimate=pl.CostEstimate(
            flops=2 * 3 * C * N * H * W,
            bytes_accessed=(C + 1) * N * H * W * 4,
            transcendentals=0,
        ),
    )(x_fused, w2, masks, b1)

    return out.reshape(N, 1, H, W)


if __name__ == "__main__":
    # Small shapes consistent with the module's forward (NCHW spectrogram-like input).
    N, C, H, W = 2, 4, 16, 16

    key = jax.random.PRNGKey(0)
    kx, kw, kb = jax.random.split(key, 3)

    x = jax.random.normal(kx, (N, C, H, W), dtype=jnp.float32)

    # Deterministic parameters with nn.Conv2d(C, 1, (1, 3)) shapes/init bounds:
    # weight: (out=1, in=C, kh=1, kw=3), bias: (1,)
    fan_in = C * 1 * 3
    bound = 1.0 / float(np.sqrt(fan_in))
    weight = jax.random.uniform(kw, (1, C, 1, 3), jnp.float32, -bound, bound)
    bias = jax.random.uniform(kb, (1,), jnp.float32, -bound, bound)

    out = conv1d_out(x, weight, bias)
    jax.block_until_ready(out)

    # Reference: XLA conv with the same 'same' semantics as torch Conv2d.
    ref = jax.lax.conv_general_dilated(
        x, weight, window_strides=(1, 1), padding=((0, 0), (1, 1)),
        dimension_numbers=("NCHW", "OIHW", "NCHW"),
    ) + bias.reshape(1, 1, 1, 1)
    assert out.shape == (N, 1, H, W)
    assert jnp.allclose(out, ref, atol=1e-5, rtol=1e-5), float(jnp.max(jnp.abs(out - ref)))

    print("KERNEL_OK")
</pallas_src>

<mosaic_0001>
module attributes {stable_mosaic.version = 11 : i64} {
  func.func @_conv1d_out_kernel(%arg0: i32, %arg1: i32, %arg2: memref<1x4x128xf32, #tpu.memory_space<vmem>>, %arg3: memref<4x3xf32, #tpu.memory_space<vmem>>, %arg4: memref<2x128xf32, #tpu.memory_space<vmem>>, %arg5: memref<1xf32, #tpu.memory_space<smem>>, %arg6: memref<1x1x128xf32, #tpu.memory_space<vmem>>) attributes {dimension_semantics = [#tpu.dimension_semantics<parallel>, #tpu.dimension_semantics<parallel>], iteration_bounds = array<i64: 2, 2>, scalar_prefetch = 0 : i64, scratch_operands = 0 : i64, tpu.core_type = #tpu.core_type<tc>, window_params = [{transform_indices = @transform_0, window_bounds = array<i64: 1, 4, 128>}, {pipeline_mode = #tpu.pipeline_mode<synchronous>, transform_indices = @transform_1, window_bounds = array<i64: 4, 3>}, {pipeline_mode = #tpu.pipeline_mode<synchronous>, transform_indices = @transform_2, window_bounds = array<i64: 2, 128>}, {transform_indices = @transform_3, window_bounds = array<i64: 1>}, {transform_indices = @transform_4, window_bounds = array<i64: 1, 1, 128>}]} {
    %c0 = arith.constant 0 : index
    %c0_0 = arith.constant 0 : index
    %c0_1 = arith.constant 0 : index
    %0 = vector.load %arg2[%c0, %c0_0, %c0_1] : memref<1x4x128xf32, #tpu.memory_space<vmem>>, vector<1x4x128xf32>
    %1 = vector.shape_cast %0 : vector<1x4x128xf32> to vector<4x128xf32>
    %c0_2 = arith.constant 0 : index
    %c0_3 = arith.constant 0 : index
    %2 = vector.load %arg3[%c0_2, %c0_3] : memref<4x3xf32, #tpu.memory_space<vmem>>, vector<4x3xf32>
    %c1_i32 = arith.constant 1 : i32
    %3 = tpu.dynamic_rotate %1 by %c1_i32 dim 1 : vector<4x128xf32>, i32 -> vector<4x128xf32>
    %c0_4 = arith.constant 0 : index
    %c0_5 = arith.constant 0 : index
    %4 = vector.load %arg4[%c0_4, %c0_5] : memref<2x128xf32, #tpu.memory_space<vmem>>, vector<1x128xf32>
    %5 = vector.broadcast %4 : vector<1x128xf32> to vector<4x128xf32>
    %6 = arith.mulf %3, %5 : vector<4x128xf32>
    %c127_i32 = arith.constant 127 : i32
    %7 = tpu.dynamic_rotate %1 by %c127_i32 dim 1 : vector<4x128xf32>, i32 -> vector<4x128xf32>
    %c1 = arith.constant 1 : index
    %c0_6 = arith.constant 0 : index
    %8 = vector.load %arg4[%c1, %c0_6] : memref<2x128xf32, #tpu.memory_space<vmem>>, vector<1x128xf32>
    %9 = vector.broadcast %8 : vector<1x128xf32> to vector<4x128xf32>
    %10 = arith.mulf %7, %9 : vector<4x128xf32>
    %11 = vector.extract_strided_slice %2 {offsets = [0, 0], sizes = [4, 1], strides = [1, 1]} : vector<4x3xf32> to vector<4x1xf32>
    %12 = vector.broadcast %11 : vector<4x1xf32> to vector<4x128xf32>
    %13 = arith.mulf %6, %12 : vector<4x128xf32>
    %14 = vector.extract_strided_slice %2 {offsets = [0, 1], sizes = [4, 1], strides = [1, 1]} : vector<4x3xf32> to vector<4x1xf32>
    %15 = vector.broadcast %14 : vector<4x1xf32> to vector<4x128xf32>
    %16 = arith.mulf %1, %15 : vector<4x128xf32>
    %17 = arith.addf %13, %16 : vector<4x128xf32>
    %18 = vector.extract_strided_slice %2 {offsets = [0, 2], sizes = [4, 1], strides = [1, 1]} : vector<4x3xf32> to vector<4x1xf32>
    %19 = vector.broadcast %18 : vector<4x1xf32> to vector<4x128xf32>
    %20 = arith.mulf %10, %19 : vector<4x128xf32>
    %21 = arith.addf %17, %20 : vector<4x128xf32>
    %cst = arith.constant dense<0.000000e+00> : vector<128xf32>
    %22 = vector.multi_reduction <add>, %21, %cst [0] : vector<4x128xf32> to vector<128xf32>
    %23 = vector.shape_cast %22 : vector<128xf32> to vector<1x128xf32>
    %c0_7 = arith.constant 0 : index
    %24 = memref.load %arg5[%c0_7] : memref<1xf32, #tpu.memory_space<smem>>
    %25 = vector.broadcast %24 : f32 to vector<1x128xf32>
    %26 = arith.addf %23, %25 : vector<1x128xf32>
    %c0_8 = arith.constant 0 : index
    %c0_9 = arith.constant 0 : index
    %c0_10 = arith.constant 0 : index
    %27 = vector.load %arg6[%c0_8, %c0_9, %c0_10] : memref<1x1x128xf32, #tpu.memory_space<vmem>>, vector<1x1x128xf32>
    %28 = vector.shape_cast %27 : vector<1x1x128xf32> to vector<1x128xf32>
    %29 = vector.shape_cast %26 : vector<1x128xf32> to vector<1x1x128xf32>
    tpu.vector_store %arg6[%c0_8, %c0_9, %c0_10], %29 {strides = array<i32>} : memref<1x1x128xf32, #tpu.memory_space<vmem>>, vector<1x1x128xf32>,
    return
  }
  func.func @transform_0(%arg0: i32, %arg1: i32) -> (i32, i32, i32) {
    %c0_i32 = arith.constant 0 : i32
    %c0_i32_0 = arith.constant 0 : i32
    return %arg0, %c0_i32, %arg1 : i32, i32, i32
  }
  func.func @transform_1(%arg0: i32, %arg1: i32) -> (i32, i32) {
    %c0_i32 = arith.constant 0 : i32
    %c0_i32_0 = arith.constant 0 : i32
    %c0_i32_1 = arith.constant 0 : i32
    return %c0_i32, %c0_i32_0 : i32, i32
  }
  func.func @transform_2(%arg0: i32, %arg1: i32) -> (i32, i32) {
    %c0_i32 = arith.constant 0 : i32
    %c0_i32_0 = arith.constant 0 : i32
    %c0_i32_1 = arith.constant 0 : i32
    return %c0_i32, %c0_i32_0 : i32, i32
  }
  func.func @transform_3(%arg0: i32, %arg1: i32) -> i32 {
    %c0_i32 = arith.constant 0 : i32
    %c0_i32_0 = arith.constant 0 : i32
    return %c0_i32 : i32
  }
  func.func @transform_4(%arg0: i32, %arg1: i32) -> (i32, i32, i32) {
    %c0_i32 = arith.constant 0 : i32
    %c0_i32_0 = arith.constant 0 : i32
    return %arg0, %c0_i32, %arg1 : i32, i32, i32
  }
}

</mosaic_0001>

<bundles_post_ra>
// kernel: tpu_custom_call.1
= control target key start
LH: loop header
LB: loop body
LE: loop exit
PB: predicated region body
PF: predicated region fallthrough
CT: control target
= control target key end

     0   :  { %s846_s0 = inlined_call_operand.hbm [shape: f32[2,4,256], index: 0, kind: input, shape index: {}]   ;;  %s847_s1 = inlined_call_operand.vmem [shape: f32[4,3], index: 1, kind: input, shape index: {}]   ;;  %s848_s2 = inlined_call_operand.vmem [shape: f32[2,128], index: 2, kind: input, shape index: {}]   ;;  %s849_s3 = inlined_call_operand.<no memory space> [shape: f32[1], index: 3, kind: input, shape index: {}]   ;;  %s850_s4 = inlined_call_operand.hbm [shape: f32[2,1,256], index: 4, kind: output, shape index: {}]  }
   0x1   :  { %9 = sst [smem:[#allocation2]] %s849_s3 }
   0x2   :  { %10 = vsyncpa [#allocation4], 0 }
   0x3   :  { %12 = vsyncpa [#allocation4 + $0x1], 0 }
   0x4   :  { %13 = vsyncpa [#allocation5], 0 }
   0x5   :  { %15 = vsyncpa [#allocation5 + $0x1], 0  ;;  %s642_s17 = smov 0   ;;  %s644_s18 = smov 0  }
   0x6   :  { %s646_s19 = smov 0   ;;  %s648_s20 = smov 0  }
   0x7   :  { %s650_s21 = smov 0   ;;  %s652_s22 = smov 0  }
   0x8   :  { %s654_s23 = smov 0   ;;  %s656_s24 = smov 0  }
   0x9 LB: > { %s375_s3 = sadd.s32 4294967295, %s605_s24   ;;  %s376_s25 = sadd.s32 4294967294, %s605_s24   ;;  %s605_s24 = sphi %s656_s24, %s21_s24   ;;  %s601_s23 = sphi %s654_s23, %s867_s23   ;;  %s597_s22 = sphi %s652_s22, %s866_s22   ;;  %s593_s21 = sphi %s650_s21, %s865_s21   ;;  %s589_s20 = sphi %s648_s20, %s864_s20   ;;  %s585_s19 = sphi %s646_s19, %s863_s19   ;;  %s581_s18 = sphi %s644_s18, %s862_s18   ;;  %s577_s17 = sphi %s642_s17, %s861_s17  }
   0xa   : > { %s30_s26 = sadd.s32 1, %s597_s22  ;;  %s33_s27 = sadd.s32 1, %s601_s23 }
   0xb   : > { %p31_p0 = scmp.ge.s32.totalorder %s30_s26, 2  ;;  %s42_s28 = sadd.s32 1, %s585_s19 }
   0xc   : > { %p49_p1 = scmp.ne.s32.totalorder %s585_s19, %s581_s18  ;;  %p50_p2 = scmp.eq.s32.totalorder %s605_s24, 0 }
   0xd   : > { %s869_s26 = smov (%p31_p0, %s30_s26), 0  ;;  %s871_s27 = smov (!%p31_p0, %s33_s27), %s601_s23 }
   0xe   : > { %s38_s29 = ssub.s32 %s597_s22, %s869_s26  ;;  %p695_p3 = por %p50_p2, %p49_p1 }
   0xf   : > { %p35_p4 = scmp.ge.s32.totalorder %s871_s27, 2  ;;  %p55_p5 = scmp.ne.s32.totalorder %s581_s18, %s577_s17 }
  0x10   : > { %p56_p6 = scmp.eq.s32.totalorder %s375_s3, 0  ;;  %p144_p7 = scmp.eq.s32.totalorder %s375_s3, 3 }
  0x11   : > { %s873_s27 = smov (%p35_p4, %s871_s27), 0  ;;  %p150_p10 = scmp.eq.s32.totalorder %s376_s25, 3 }
  0x12   : > { %p703_p8 = por %p56_p6, %p55_p5  ;;  %p707_p9 = por %p144_p7, %p49_p1 }
  0x13   : > { %s37_s7 = ssub.s32 %s601_s23, %s873_s27  ;;  %p713_p12 = por %p150_p10, %p55_p5 }
  0x14   : > { %s854_s6 = scalar_select %p707_p9, 1, 0 }
  0x15   : > { %s39_s8 = sor.u32 %s38_s29, %s37_s7  ;;  %p402_p13 = scmp.lt.s32.totalorder %s605_s24, 4 }
  0x16   : > { %p40_p11 = scmp.eq.s32.totalorder %s39_s8, 0  ;;  %s179_s10 = sand.u32 1, %s585_s19  }
  0x17   : > { %s855_s9 = scalar_select %p713_p12, 1, 0 }
  0x18   : > { %s720_s11 = scalar_select %p40_p11, %s585_s19, %s42_s28  }
  0x19   : > { %s379_s12 = sshll.u32 %s179_s10, 2  ;;  %s380_s13 = sshll.u32 %s601_s23, 1 }
  0x1a   : > { %s188_s14 = sadd.s32 %s597_s22, %s380_s13  ;;  %s183_s15 = scalar_lea.vmem [#allocation3], %s379_s12 }
  0x1b   : > { %s192_s16 = sshll.u32 %s183_s15, 4  ;;  %s381_s3 = sshll.u32 %s188_s14, 6  ;;  %s724_s16 = int_to_ptr.vmem [resolvable:$true] %s192_s16 }
  0x1c   : > { %s729_s7 = scalar_lea.hbm %s846_s0, %s381_s3  ;;  %p733_p0 = pnand %p402_p13, %p695_p3 }
  0x1d   : > { %s180_s8 = scalar_lea.sflag [#allocation4], %s179_s10  ;;  %s477_s12 = scalar_lea.hbm %s729_s7, 64 }
  0x1e   : > { %p478_p4 = scmp.ne.s32.totalorder %s729_s7, %s477_s12  ;;  %p479_p5 = pneg %p733_p0 }
  0x1f   : > { %s482_s14 = scalar_lea.hbm %s846_s0, 256  ;;  %p483_p3 = scmp.lt.u32.totalorder %s729_s7, %s846_s0 }
  0x20   : > { %p480_p6 = pnand %p479_p5, %p478_p4  ;;  %p484_p10 = scmp.lt.u32.totalorder %s482_s14, %s477_s12 }
  0x21   : > { %p486_p13 = scmp.lt.u32.totalorder %s477_s12, %s729_s7 }
  0x22   : > { %p481_p7 = pneg %p480_p6  ;;  %p485_p11 = por %p484_p10, %p483_p3 }
  0x24   : > { %p487_p1 = por %p486_p13, %p485_p11 }
  0x26   : > { %p488_p2 = pnand %p487_p1, %p481_p7 }
  0x28   : > { %491 = shalt.err (!%p488_p2)
}
  0x29   : > { %s492_s10 = scalar_lea.vmem %s724_s16, 64  ;;  %s607_s25 = smov [#allocation3]  }
  0x2a   : > { %p493_p4 = scmp.ne.s32.totalorder %s724_s16, %s492_s10  ;;  %s497_s29 = sshll.u32 %s607_s25, 4  ;;  %s498_s29 = int_to_ptr.vmem [resolvable:$false] %s497_s29 }
  0x2b   : > { %s499_s30 = scalar_lea.vmem %s498_s29, 128  ;;  %p500_p9 = scmp.lt.s32.totalorder %s724_s16, %s498_s29 }
  0x2c   : > { %p495_p6 = pnand %p493_p4, %p479_p5  ;;  %p501_p3 = scmp.lt.s32.totalorder %s499_s30, %s492_s10 }
  0x2e   : > { %p496_p12 = pneg %p495_p6  ;;  %p502_p10 = por %p501_p3, %p500_p9 }
  0x30   : > { %p503_p11 = pnand %p502_p10, %p496_p12 }
  0x32   : > { %506 = shalt.err (!%p503_p11)
}
  0x33   : > { %397 = dma.hbm_to_vmem [thread:$0]  (!%p733_p0), %s729_s7, 64, %s724_s16, %s180_s8  }
  0x34   : > { %p857_p1 = scmp.lt.s32.totalorder %s605_s24, 5  ;;  %p858_p2 = scmp.ge.s32.totalorder %s605_s24, 1 }
  0x36   : > { %p198_p5 = pnand %p858_p2, %p857_p1 }
  0x37   : > { %s769_s12 = sand.u32 (!%p198_p5), 1, %s581_s18  }
  0x38   : > { %201 = sbr.rel (%p198_p5) target bundleno = 237 (0xed), region = 36  ;;  %s383_s13 = sshll.u32 (!%p198_p5), %s769_s12, 2 }
  0x39   : > { %s204_s14 = scalar_lea.sflag (!%p198_p5), [#allocation4], %s769_s12  ;;  %s207_s15 = scalar_lea.vmem (!%p198_p5), [#allocation3], %s383_s13 }
  0x3f   : > { %568 = dma.done.wait (%p703_p8), %s204_s14, 64  }
  0x40   : > { %570 = vsyncadd (%p703_p8), %s204_s14, 4294967232  ;;  %v608_v0 = vmov 2   ;;  %v609_v1 = vmov 0   ;;  %v232_v2 = vld [vmem:[%s847_s1] sm:$0xf]  ;;  %v610_v4 = vmov 1  }
  0x41   : > { %475 = vset.pattern.permute.xlu1 %v608_v0  ;;  %473 = vset.pattern.permute.xlu0 %v609_v1  ;;  %v231_v3 = vld [vmem:[%s207_s15] sm:$0xf]  ;;  %s611_s28 = smov 1   ;;  %s612_s8 = smov 127   ;;  %vm267_vm0 = vcmask 1043456  }
  0x42   : > { %262 = vperm.xlu1 %475, %v232_v2   ;;  %251 = vperm.xlu0 %473, %v232_v2   ;;  %v384_v7 = vld [vmem:[%s848_s2] ss:$0 sm:$0xff]  ;;  %v385_v11 = vld [vmem:[%s848_s2 + $0x1] ss:$0 sm:$0xff]  ;;  %s275_s29 = sld [smem:[#allocation2]]  ;;  %s386_s30 = sshll.u32 %s593_s21, 1 }
  0x43   : > { %s290_s13 = sadd.s32 %s589_s20, %s386_s30  ;;  %s230_s15 = scalar_lea.vmem [#allocation6], %s769_s12 }
  0x44   : > { %s387_s14 = sshll.u32 %s290_s13, 4  ;;  %s294_s16 = sshll.u32 %s230_s15, 4  ;;  %s794_s16 = int_to_ptr.vmem [resolvable:$true] %s294_s16 }
  0x45   : > { %s280_s21 = scalar_lea.sflag [#allocation5], %s769_s12  ;;  %s507_s20 = scalar_lea.vmem %s794_s16, 16 }
  0x46   : > { %474 = vset.pattern.permute.xlu0 %v610_v4  ;;  %233 = vrot.lane.b32.xlu1 %v231_v3, %s611_s28  ;;  %p508_p8 = scmp.ne.s32.totalorder %s794_s16, %s507_s20  ;;  %p859_p9 = scmp.ne.s32.totalorder %s854_s6, 0 }
  0x47   : > { %256 = vperm.xlu0 %474, %v232_v2   ;;  %s613_s5 = smov [#allocation6]  }
  0x48   : > { %v276_v25 = vstv %s275_s29  ;;  %p509_p12 = pnand %p508_p8, %p859_p9  ;;  %s511_s3 = sshll.u32 %s613_s5, 4  ;;  %s512_s3 = int_to_ptr.vmem [resolvable:$false] %s511_s3 }
  0x49   : > { %s513_s10 = scalar_lea.vmem %s512_s3, 32  ;;  %p514_p7 = scmp.lt.s32.totalorder %s794_s16, %s512_s3 }
  0x4a   : > { %241 = vrot.lane.b32.xlu1 %v231_v3, %s612_s8  ;;  %s792_s8 = scalar_lea.hbm %s850_s4, %s387_s14  ;;  %p510_p0 = pneg %p509_p12 }
  0x4b   : > { %476 = vset.pattern.permute.xlu0 %v608_v0  ;;  %p515_p13 = scmp.lt.s32.totalorder %s513_s10, %s507_s20 }
  0x4d   : > { %p516_p4 = por %p515_p13, %p514_p7 }
  0x4f   : > { %p517_p6 = pnand %p516_p4, %p510_p0 }
  0xc1   : > { %v263_v5 = vpop.permute.xlu1 %262  ;;  %v252_v6 = vpop.permute.xlu0 %251 }
  0xc5   : > { %v234_v8 = vpop.permute.xlu1 %233 }
  0xc6   : > { %v240_v9 = vmul.f32 %v384_v7, %v234_v8  ;;  %v257_v10 = vpop.permute.xlu0 %256 }
  0xc7   : > { %v259_v13 = vmul.f32 %v257_v10, %v231_v3 }
  0xc8   : > { %v254_v12 = vmul.f32 %v252_v6, %v240_v9 }
  0xc9   : > { %v242_v14 = vpop.permute.xlu1 %241 }
  0xca   : > { %v248_v15 = vmul.f32 %v385_v11, %v242_v14  ;;  %v260_v16 = vadd.f32 %v259_v13, %v254_v12 }
  0xcc   : > { %v265_v17 = vmul.f32 %v263_v5, %v248_v15 }
  0xce   : > { %v266_v18 = vadd.f32 %v265_v17, %v260_v16 }
  0xd0   : > { %v268_v19 = vsel %vm267_vm0, %v266_v18, 0.0 }
  0xd1   : > { %v269_v20 = vrot.slane %v268_v19, 4 }
  0xd3   : > { %v270_v21 = vadd.f32 %v269_v20, %v268_v19 }
  0xd5   : > { %v271_v22 = vrot.slane %v270_v21, 2 }
  0xd7   : > { %v272_v23 = vadd.f32 %v271_v22, %v270_v21 }
  0xd9   : > { %v273_v24 = vrot.slane %v272_v23, 1 }
  0xdb   : > { %v274_v26 = vadd.f32 %v273_v24, %v272_v23 }
  0xdd   : > { %v277_v27 = vadd.f32 %v276_v25, %v274_v26 }
  0xdf   : > { %278 = vst [vmem:[%s230_s15] sm:$0x1] %v277_v27 }
  0xe0   : > { %520 = shalt.err (!%p517_p6)
}
  0xe1   : > { %s521_s12 = scalar_lea.hbm %s792_s8, 16  ;;  %s525_s30 = scalar_lea.hbm %s850_s4, 64 }
  0xe2   : > { %p522_p3 = scmp.ne.s32.totalorder %s792_s8, %s521_s12  ;;  %p526_p1 = scmp.lt.u32.totalorder %s792_s8, %s850_s4 }
  0xe3   : > { %p527_p2 = scmp.lt.u32.totalorder %s525_s30, %s521_s12  ;;  %p529_p8 = scmp.lt.u32.totalorder %s521_s12, %s792_s8 }
  0xe4   : > { %p523_p10 = pnand %p522_p3, %p859_p9 }
  0xe5   : > { %p528_p5 = por %p527_p2, %p526_p1 }
  0xe6   : > { %p524_p11 = pneg %p523_p10 }
  0xe7   : > { %p530_p12 = por %p529_p8, %p528_p5 }
  0xe9   : > { %p531_p0 = pnand %p530_p12, %p524_p11 }
  0xeb   : > { %534 = shalt.err (!%p531_p0)
}
  0xec   : > { %392 = dma.vmem_to_hbm [thread:$0]  (%p859_p9), %s794_s16, 16, %s792_s8, %s280_s21  }
  0xed PF: > { %p403_p7 = scmp.ge.s32.totalorder %s605_s24, 2  ;;  %s306_s15 = sand.u32 1, %s577_s17  }
  0xee   : > { %p860_p13 = scmp.ne.s32.totalorder %s855_s9, 0  ;;  %s307_s7 = scalar_lea.sflag [#allocation5], %s306_s15 }
  0xf0   : > { %p399_p4 = pnand %p403_p7, %p860_p13 }
  0xf2   : > { %572 = dma.done.wait (!%p399_p4), %s307_s7, 16  }
  0xf3   : > { %574 = vsyncadd (!%p399_p4), %s307_s7, 4294967280  ;;  %s21_s24 = sadd.s32 1, %s605_s24   ;;  %s861_s17 = smov %s581_s18 }
  0xf4   : > { %p18_p6 = scmp.ge.s32.totalorder %s21_s24, 6   ;;  %s862_s18 = smov %s585_s19 }
  0xf5   : > { %s863_s19 = smov %s720_s11  ;;  %s864_s20 = smov %s597_s22 }
  0xf6   : > { %s865_s21 = smov %s601_s23  ;;  %s866_s22 = smov %s869_s26 }
  0xf7   : > { %s867_s23 = smov %s873_s27  ;;  %20 = sbr.rel (!%p18_p6) target bundleno = 9 (0x9), region = 81 }
  0xfe   :  { %311 = vsyncpa [#allocation4], 1 }
  0xff   :  { %313 = vsyncpa [#allocation4 + $0x1], 1 }
 0x100   :  { %314 = vsyncpa [#allocation5], 1 }
 0x101   :  { %316 = vsyncpa [#allocation5 + $0x1], 1 }

</bundles_post_ra>
